<compile_context>
chip_gen: v7x
topology: tpu7x:2x2x1
jax: 0.10.0
libtpu: 0.0.40
codegen_flags: <defaults>
</compile_context>

<pallas_src>
import functools

import jax
import jax.numpy as jnp
from jax.experimental import pallas as pl
from jax.experimental.pallas import tpu as pltpu


# ----------------------------- small helpers ---------------------------------

def _round_up(x, m):
    return ((x + m - 1) // m) * m


def _cdiv(a, b):
    return -(-a // b)


def _sublane(dtype):
    # rows per packed sublane group: f32 -> 8, bf16 -> 16, int8/fp8 -> 32
    return max(8, 32 // jnp.dtype(dtype).itemsize)


def _vmem_budget(budget_bytes=None):
    """(working-set budget for tile planning, vmem_limit_bytes for the compiler)."""
    try:
        cap = int(pltpu.get_tpu_info().vmem_capacity_bytes)
    except Exception:  # no TPU info available -> assume the smallest (v7x: 64 MiB/TC)
        cap = 64 << 20
    budget = min((cap * 3) // 4, 48 << 20) if budget_bytes is None else int(budget_bytes)
    limit = min(max(budget + (4 << 20), 32 << 20), (cap * 7) // 8)
    return budget, int(limit)


def _fit_tm(tm, n, sub):
    """Clamp a row-tile size to the problem and to sublane packing; split for megacore."""
    tm = min(int(tm), 2048, _round_up(n, sub))
    tm = max((tm // sub) * sub, sub)
    # If one tile would cover every row, split it so both v7x TensorCores get work.
    if _cdiv(n, tm) == 1 and n > sub:
        tm = _round_up(_cdiv(n, 2), sub)
    return int(tm)


# ------------------------------- kernels --------------------------------------

def _logreg_kernel_resident(x_ref, w_ref, b_ref, o_ref):
    # x: [TM, F], w: [F, C_pad] (resident), b: [1, C_pad], o: [TM, C_pad]
    acc = jnp.dot(x_ref[...], w_ref[...], preferred_element_type=jnp.float32)
    o_ref[...] = (acc + b_ref[...].astype(jnp.float32)).astype(o_ref.dtype)


def _logreg_kernel_ktiled(x_ref, w_ref, b_ref, o_ref, acc_ref, *, k_rem):
    # grid = (row_tiles, k_tiles); x: [TM, TK], w: [TK, C_pad], acc: [TM, C_pad] f32
    k = pl.program_id(1)
    nk = pl.num_programs(1)

    @pl.when(k == 0)
    def _init():
        acc_ref[...] = jnp.zeros_like(acc_ref)

    x = x_ref[...]
    w = w_ref[...]
    if k_rem:  # static: ft_in is not a multiple of TK -> zero the K overhang on the last step
        not_last = k != nk - 1
        col = jax.lax.broadcasted_iota(jnp.int32, x.shape, 1)
        row = jax.lax.broadcasted_iota(jnp.int32, w.shape, 0)
        x = jnp.where(jnp.logical_or(not_last, col < k_rem), x, 0)
        w = jnp.where(jnp.logical_or(not_last, row < k_rem), w, 0)

    acc_ref[...] += jnp.dot(x, w, preferred_element_type=jnp.float32)

    @pl.when(k == nk - 1)
    def _finalize():
        o_ref[...] = (acc_ref[...] + b_ref[...].astype(jnp.float32)).astype(o_ref.dtype)


# ---------------------------- parameter prep ----------------------------------

def prepare_logreg_params(weight, bias, *, dtype=None, lane_multiple=None):
    """One-time parameter prep, hoisted out of the forward path.

    * transpose to [ft_in, C] so the kernel does x @ W,
    * zero-pad the class dim to a lane multiple (128; 256 when C > 128 to fill the
      256-wide MXU on v6e/v7x) for lane-dense output stores,
    * optionally cast the weight to the streaming compute dtype (e.g. bf16) once
      here instead of per call.  Bias stays f32 (tiny; added in f32).
    """
    nb_classes, ft_in = weight.shape
    if lane_multiple is None:
        lane_multiple = 256 if nb_classes > 128 else 128
    if dtype is not None:
        weight = weight.astype(dtype)
    c_pad = _round_up(nb_classes, lane_multiple)
    w_t = jnp.zeros((ft_in, c_pad), weight.dtype).at[:, :nb_classes].set(weight.T)
    b2 = jnp.zeros((1, c_pad), jnp.float32).at[0, :nb_classes].set(bias.astype(jnp.float32))
    return w_t, b2, nb_classes


# -------------------------------- forward -------------------------------------

def logreg_forward(seq, w_t_pad, b_pad, nb_classes, *, tm=None, tk=None,
                   out_dtype=None, trim=True, budget_bytes=None, force_k_tiling=None):
    """y = seq @ W^T + b  (nn.Linear forward).

    seq:     [N, ft_in]  -- streamed as-is; its dtype IS the compute dtype
             (cast upstream / in prepare, never here).
    w_t_pad: [ft_in, C_pad], b_pad: [1, C_pad]  from prepare_logreg_params.
    trim=False returns the padded (N, C_pad) slab (skips the post-kernel slice).
    """
    n, ft_in = seq.shape
    assert w_t_pad.shape[0] == ft_in, "weight/seq feature dims disagree"
    c_pad = w_t_pad.shape[1]
    out_dtype = seq.dtype if out_dtype is None else out_dtype

    x_bytes = jnp.dtype(seq.dtype).itemsize
    w_bytes = jnp.dtype(w_t_pad.dtype).itemsize
    out_bytes = jnp.dtype(out_dtype).itemsize
    sub = max(_sublane(seq.dtype), _sublane(out_dtype))

    budget, vmem_limit = _vmem_budget(budget_bytes)

    # --- choose path: resident weight vs. K-tiled reduction -----------------
    resident_w = ft_in * c_pad * w_bytes + c_pad * 4          # 1 buffer (pl.Buffered(1))
    per_row = 2 * ft_in * x_bytes + 2 * c_pad * out_bytes      # x + out, double-buffered
    resident_tm = (budget - resident_w) // per_row if budget > resident_w else 0
    use_ktile = (resident_w > budget // 2) or (resident_tm < 128)
    if tk is not None:
        use_ktile = True
    if force_k_tiling is not None:
        use_ktile = bool(force_k_tiling)

    if not use_ktile:
        # ------------------- resident-weight path ----------------------------
        if tm is None:
            tm = max(resident_tm, sub)
        tm = _fit_tm(tm, n, sub)
        n_row_tiles = _cdiv(n, tm)
        cost = pl.CostEstimate(
            flops=2 * n * ft_in * c_pad,
            transcendentals=0,
            bytes_accessed=n * ft_in * x_bytes + ft_in * c_pad * w_bytes
                           + c_pad * 4 + n * c_pad * out_bytes)
        out = pl.pallas_call(
            _logreg_kernel_resident,
            out_shape=jax.ShapeDtypeStruct((n, c_pad), out_dtype),
            grid_spec=pltpu.PrefetchScalarGridSpec(
                num_scalar_prefetch=0,
                grid=(n_row_tiles,),
                in_specs=[
                    pl.BlockSpec((tm, ft_in), lambda i: (i, 0)),            # x streams
                    pl.BlockSpec((ft_in, c_pad), lambda i: (0, 0),
                                 pipeline_mode=pl.Buffered(1)),             # W resident, 1 buf
                    pl.BlockSpec((1, c_pad), lambda i: (0, 0),
                                 pipeline_mode=pl.Buffered(1)),             # bias resident, 1 buf
                ],
                out_specs=pl.BlockSpec((tm, c_pad), lambda i: (i, 0)),
            ),
            compiler_params=pltpu.CompilerParams(
                dimension_semantics=("parallel",),
                vmem_limit_bytes=vmem_limit),
            cost_estimate=cost,
        )(seq, w_t_pad, b_pad)
    else:
        # ----------------------- K-tiled path ---------------------------------
        if tk is None:
            tk = 512 if ft_in > 512 else 256
        tk = max(128, _round_up(min(int(tk), _round_up(ft_in, 128)), 128))
        if tm is None:
            fixed = 2 * tk * c_pad * w_bytes + c_pad * 4                   # W (2 bufs) + bias
            per_row_kt = 2 * tk * x_bytes + 2 * c_pad * out_bytes + c_pad * 4  # x/out + f32 acc
            tm = (budget - fixed) // per_row_kt if budget > fixed else sub
            tm = max(tm, sub)
        tm = _fit_tm(tm, n, sub)
        n_row_tiles = _cdiv(n, tm)
        nk = _cdiv(ft_in, tk)
        k_rem = ft_in - (nk - 1) * tk
        k_rem = 0 if k_rem == tk else k_rem
        kernel = functools.partial(_logreg_kernel_ktiled, k_rem=k_rem)
        cost = pl.CostEstimate(
            flops=2 * n * ft_in * c_pad,
            transcendentals=0,
            bytes_accessed=n * ft_in * x_bytes
                           + n_row_tiles * ft_in * c_pad * w_bytes   # W re-read per row tile
                           + c_pad * 4 + n * c_pad * out_bytes)
        out = pl.pallas_call(
            kernel,
            out_shape=jax.ShapeDtypeStruct((n, c_pad), out_dtype),
            grid_spec=pltpu.PrefetchScalarGridSpec(
                num_scalar_prefetch=0,
                grid=(n_row_tiles, nk),
                in_specs=[
                    pl.BlockSpec((tm, tk), lambda i, k: (i, k)),            # x: (row, k) tile
                    pl.BlockSpec((tk, c_pad), lambda i, k: (k, 0)),         # W: k tile
                    pl.BlockSpec((1, c_pad), lambda i, k: (0, 0),
                                 pipeline_mode=pl.Buffered(1)),             # bias resident
                ],
                out_specs=pl.BlockSpec((tm, c_pad), lambda i, k: (i, 0)),   # resident across k
                scratch_shapes=[pltpu.VMEM((tm, c_pad), jnp.float32)],
            ),
            compiler_params=pltpu.CompilerParams(
                dimension_semantics=("parallel", "arbitrary"),
                vmem_limit_bytes=vmem_limit),
            cost_estimate=cost,
        )(seq, w_t_pad, b_pad)

    if trim and nb_classes != c_pad:
        out = out[:, :nb_classes]
    return out


def init_logreg_params(key, ft_in, nb_classes, dtype=jnp.float32):
    """Deterministic init matching the module: xavier_uniform_ weight, zero bias."""
    a = (6.0 / (ft_in + nb_classes)) ** 0.5
    weight = jax.random.uniform(key, (nb_classes, ft_in), dtype=dtype, minval=-a, maxval=a)
    bias = jnp.zeros((nb_classes,), dtype=dtype)
    return weight, bias


# --------------------------------- tests ---------------------------------------

if __name__ == "__main__":
    key = jax.random.PRNGKey(0)
    k1, k2, k3, k4, k5, k6, k7, k8, k9 = jax.random.split(key, 9)

    # 1) small shape matching the module (module-faithful init: zero bias), f32.
    N, FT, NC = 8, 32, 16
    seq = jax.random.normal(k1, (N, FT), dtype=jnp.float32)
    weight, bias = init_logreg_params(k2, FT, NC)
    w_t, b_p, nc = prepare_logreg_params(weight, bias)
    out = jax.block_until_ready(logreg_forward(seq, w_t, b_p, nc))
    ref = seq @ weight.T + bias
    assert out.shape == (N, NC)
    assert jnp.allclose(out, ref, atol=1e-5, rtol=1e-5)

    # 2) moderate shape: multi-row-tile grid with a partial edge tile (no pre-padding),
    #    class padding 40 -> 128, random bias to exercise the bias add.
    N2, FT2, NC2 = 1030, 256, 40
    seq2 = jax.random.normal(k3, (N2, FT2), dtype=jnp.float32)
    w2, _ = init_logreg_params(k4, FT2, NC2)
    b2 = jax.random.normal(k5, (NC2,), dtype=jnp.float32)
    w_t2, b_p2, nc2 = prepare_logreg_params(w2, b2)
    out2 = jax.block_until_ready(logreg_forward(seq2, w_t2, b_p2, nc2))
    ref2 = seq2 @ w2.T + b2
    assert out2.shape == (N2, NC2)
    assert jnp.allclose(out2, ref2, atol=1e-4, rtol=1e-4)

    # 3) K-tiled fallback path: forced small VMEM budget, ft_in not a multiple of TK
    #    (exercises the in-kernel K-overhang masking and the f32 accumulator epilogue).
    N3, FT3, NC3 = 260, 700, 24
    seq3 = jax.random.normal(k6, (N3, FT3), dtype=jnp.float32)
    w3, _ = init_logreg_params(k7, FT3, NC3)
    b3 = jax.random.normal(k8, (NC3,), dtype=jnp.float32)
    w_t3, b_p3, nc3 = prepare_logreg_params(w3, b3)
    out3 = jax.block_until_ready(
        logreg_forward(seq3, w_t3, b_p3, nc3, tk=256, force_k_tiling=True,
                       budget_bytes=2 << 20))
    ref3 = seq3 @ w3.T + b3
    assert out3.shape == (N3, NC3)
    assert jnp.allclose(out3, ref3, atol=3e-4, rtol=3e-4)

    # 4) bf16 streaming path: weight cast hoisted into prepare, seq already bf16 from
    #    the "producer", TM rounded to the bf16 sublane multiple (16).
    N4, FT4, NC4 = 32, 128, 10
    seq4 = jax.random.normal(k9, (N4, FT4), dtype=jnp.float32).astype(jnp.bfloat16)
    w4, b4 = init_logreg_params(k2, FT4, NC4)
    w_t4, b_p4, nc4 = prepare_logreg_params(w4, b4, dtype=jnp.bfloat16)
    out4 = jax.block_until_ready(logreg_forward(seq4, w_t4, b_p4, nc4))
    ref4 = seq4.astype(jnp.float32) @ w4.astype(jnp.bfloat16).astype(jnp.float32).T + b4
    assert out4.shape == (N4, NC4)
    assert jnp.allclose(out4.astype(jnp.float32), ref4, atol=5e-2, rtol=5e-2)

    print("KERNEL_OK")
</pallas_src>

<mosaic_0001>
module attributes {stable_mosaic.version = 11 : i64} {
  func.func @_logreg_kernel_resident(%arg0: i32, %arg1: memref<8x32xf32, #tpu.memory_space<vmem>>, %arg2: memref<32x128xf32, #tpu.memory_space<vmem>>, %arg3: memref<1x128xf32, #tpu.memory_space<vmem>>, %arg4: memref<8x128xf32, #tpu.memory_space<vmem>>) attributes {dimension_semantics = [#tpu.dimension_semantics<parallel>], iteration_bounds = array<i64: 1>, scalar_prefetch = 0 : i64, scratch_operands = 0 : i64, tpu.core_type = #tpu.core_type<tc>, window_params = [{transform_indices = @transform_0, window_bounds = array<i64: 8, 32>}, {pipeline_mode = #tpu.pipeline_mode<synchronous>, transform_indices = @transform_1, window_bounds = array<i64: 32, 128>}, {pipeline_mode = #tpu.pipeline_mode<synchronous>, transform_indices = @transform_2, window_bounds = array<i64: 1, 128>}, {transform_indices = @transform_3, window_bounds = array<i64: 8, 128>}]} {
    %c0 = arith.constant 0 : index
    %c0_0 = arith.constant 0 : index
    %0 = vector.load %arg1[%c0, %c0_0] : memref<8x32xf32, #tpu.memory_space<vmem>>, vector<8x32xf32>
    %c0_1 = arith.constant 0 : index
    %c0_2 = arith.constant 0 : index
    %1 = vector.load %arg2[%c0_1, %c0_2] : memref<32x128xf32, #tpu.memory_space<vmem>>, vector<32x128xf32>
    %cst = arith.constant dense<0.000000e+00> : vector<8x128xf32>
    %2 = tpu.matmul %0, %1, %cst {dimension_numbers = #tpu.dot_dimension_numbers<[1], [0], [0], [1], [0, 0, 1, 1], [], []>} : vector<8x32xf32>, vector<32x128xf32>, vector<8x128xf32> -> vector<8x128xf32>
    %c0_3 = arith.constant 0 : index
    %c0_4 = arith.constant 0 : index
    %3 = vector.load %arg3[%c0_3, %c0_4] : memref<1x128xf32, #tpu.memory_space<vmem>>, vector<1x128xf32>
    %4 = vector.broadcast %3 : vector<1x128xf32> to vector<8x128xf32>
    %5 = arith.addf %2, %4 : vector<8x128xf32>
    %c0_5 = arith.constant 0 : index
    %c0_6 = arith.constant 0 : index
    %6 = vector.load %arg4[%c0_5, %c0_6] : memref<8x128xf32, #tpu.memory_space<vmem>>, vector<8x128xf32>
    tpu.vector_store %arg4[%c0_5, %c0_6], %5 {strides = array<i32>} : memref<8x128xf32, #tpu.memory_space<vmem>>, vector<8x128xf32>,
    return
  }
  func.func @transform_0(%arg0: i32) -> (i32, i32) {
    %c0_i32 = arith.constant 0 : i32
    %c0_i32_0 = arith.constant 0 : i32
    return %arg0, %c0_i32 : i32, i32
  }
  func.func @transform_1(%arg0: i32) -> (i32, i32) {
    %c0_i32 = arith.constant 0 : i32
    %c0_i32_0 = arith.constant 0 : i32
    %c0_i32_1 = arith.constant 0 : i32
    return %c0_i32, %c0_i32_0 : i32, i32
  }
  func.func @transform_2(%arg0: i32) -> (i32, i32) {
    %c0_i32 = arith.constant 0 : i32
    %c0_i32_0 = arith.constant 0 : i32
    %c0_i32_1 = arith.constant 0 : i32
    return %c0_i32, %c0_i32_0 : i32, i32
  }
  func.func @transform_3(%arg0: i32) -> (i32, i32) {
    %c0_i32 = arith.constant 0 : i32
    %c0_i32_0 = arith.constant 0 : i32
    return %arg0, %c0_i32 : i32, i32
  }
}

</mosaic_0001>

<bundles_post_ra>
// kernel: tpu_custom_call.1
= control target key start
LH: loop header
LB: loop body
LE: loop exit
PB: predicated region body
PF: predicated region fallthrough
CT: control target
= control target key end

     0   :  { %8 = vsyncpa [#allocation3], 0  ;;  %s322_s0 = inlined_call_operand.hbm [shape: f32[8,32], index: 0, kind: input, shape index: {}]   ;;  %s323_s1 = inlined_call_operand.hbm [shape: f32[32,128], index: 1, kind: input, shape index: {}]   ;;  %s324_s2 = inlined_call_operand.vmem [shape: f32[1,128], index: 2, kind: input, shape index: {}]   ;;  %s325_s3 = inlined_call_operand.hbm [shape: f32[8,128], index: 3, kind: output, shape index: {}]  }
   0x1   :  { %9 = vsyncpa [#allocation6], 0 }
   0x2   :  { %10 = vsyncpa [#allocation4], 0  ;;  %s248_s12 = smov [#allocation2]   ;;  %s249_s14 = smov [#allocation5]  }
   0x3   :  { %s17_s13 = sshll.u32 %s248_s12, 4  ;;  %s26_s15 = sshll.u32 %s249_s14, 4  ;;  %s18_s13 = int_to_ptr.vmem [resolvable:$true] %s17_s13  ;;  %s276_s15 = int_to_ptr.vmem [resolvable:$true] %s26_s15 }
   0x4   :  { %s176_s18 = scalar_lea.hbm %s322_s0, 128 }
   0x5   :  { %p177_p0 = scmp.ne.s32.totalorder %s322_s0, %s176_s18  ;;  %p180_p1 = scmp.lt.u32.totalorder %s176_s18, %s322_s0 }
   0x7   :  { %p182_p2 = pnand %p180_p1, %p177_p0 }
   0x9   :  { %185 = shalt.err (!%p182_p2)
}
   0xa   :  { %s186_s23 = scalar_lea.vmem %s18_s13, 128  ;;  %p191_p4 = scmp.lt.s32.totalorder %s18_s13, %s18_s13 }
   0xb   :  { %p187_p3 = scmp.ne.s32.totalorder %s18_s13, %s186_s23  ;;  %p192_p5 = scmp.lt.s32.totalorder %s186_s23, %s186_s23 }
   0xd   :  { %p193_p6 = por %p192_p5, %p191_p4 }
   0xf   :  { %p194_p7 = pnand %p193_p6, %p187_p3 }
  0x11   :  { %197 = shalt.err (!%p194_p7)
}
  0x12   :  { %20 = dma.hbm_to_vmem [thread:$0]  %s322_s0, 128, %s18_s13, [#allocation3]  }
  0x13   :  { %s198_s28 = scalar_lea.hbm %s323_s1, 512 }
  0x14   :  { %p199_p8 = scmp.ne.s32.totalorder %s323_s1, %s198_s28  ;;  %p202_p9 = scmp.lt.u32.totalorder %s198_s28, %s323_s1 }
  0x16   :  { %p204_p10 = pnand %p202_p9, %p199_p8 }
  0x18   :  { %207 = shalt.err (!%p204_p10)
}
  0x19   :  { %s208_s6 = scalar_lea.vmem %s276_s15, 512  ;;  %p213_p12 = scmp.lt.s32.totalorder %s276_s15, %s276_s15 }
  0x1a   :  { %p209_p11 = scmp.ne.s32.totalorder %s276_s15, %s208_s6  ;;  %p214_p13 = scmp.lt.s32.totalorder %s208_s6, %s208_s6 }
  0x1c   :  { %p215_p0 = por %p214_p13, %p213_p12 }
  0x1e   :  { %p216_p1 = pnand %p215_p0, %p209_p11 }
  0x20   :  { %219 = shalt.err (!%p216_p1)
}
  0x21   :  { %s250_s0 = smov 128   ;;  %s251_s7 = smov 8  }
  0x22   :  { %32 = dma.hbm_to_vmem [thread:$0]  %s323_s1, 512, %s276_s15, [#allocation6], %s250_s0, %s250_s0, %s251_s7  }
  0x23   :  { %242 = dma.done.wait [#allocation3], 128  }
  0x24   :  { %243 = vsyncadd [#allocation3], 4294967168 }
  0x25   :  { %244 = dma.done.wait [#allocation6], 512  }
  0x26   :  { %245 = vsyncadd [#allocation6], 4294966784  ;;  %v252_v0 = vmov 0.0|0.0   ;;  %vm253_vm0 = vmmov 0   ;;  %v254_v1 = vmov 0.0   ;;  %v42_v2 = vld [vmem:[#allocation5] sm:$0xff] }
  0x27   :  { %162 = vmatprep.subr.bf16.mxu0 %v252_v0  ;;  %159 = vmatprep.mubr.msk.f32.mxu0 %vm253_vm0, %v254_v1  ;;  %v43_v3 = vld [vmem:[#allocation5 + $0x8] sm:$0xff]  ;;  %v44_v4 = vld [vmem:[#allocation5 + $0x10] sm:$0xff]  ;;  %v45_v6 = vld [vmem:[#allocation5 + $0x18] sm:$0xff]  ;;  %vm53_vm1 = vcmask 261120   ;;  %s255_s11 = smov [#allocation7]  }
  0x28   :  { %v163_v5 = vpack.c.bf16 %v43_v3, %v42_v2  ;;  %v166_v7 = vpack.c.bf16 %v45_v6, %v44_v4  ;;  %v41_v8 = vld [vmem:[#allocation2] sm:$0xff]  ;;  %s134_s12 = sshll.u32 %s255_s11, 4  ;;  %s135_s12 = int_to_ptr.vmem [resolvable:$true] %s134_s12 }
  0x29   :  { %v144_v9 = vld [vmem:[%s324_s2] ss:$0 sm:$0xff]  ;;  %s220_s13 = scalar_lea.vmem %s135_s12, 128  ;;  %p225_p3 = scmp.lt.s32.totalorder %s135_s12, %s135_s12 }
  0x2a   :  { %164 = vmatpush3.bf16.msra.mxu0 %v163_v5  ;;  %p221_p2 = scmp.ne.s32.totalorder %s135_s12, %s220_s13  ;;  %p226_p4 = scmp.lt.s32.totalorder %s220_s13, %s220_s13 }
  0x2b   :  { %165 = vmatprep.subr.bf16.mxu0 %v252_v0 }
  0x2c   :  { %p227_p5 = por %p226_p4, %p225_p3 }
  0x2e   :  { %167 = vmatpush3.bf16.msra.mxu0 %v166_v7  ;;  %p228_p6 = pnand %p227_p5, %p221_p2 }
  0x31   :  { %160 = vmatmul.mubr.msk.f32.vlgmr.msra.gmra.mrb[0].mxu0 %vm53_vm1, %v41_v8 }
 0x104   :  { %v123_v10 = vpop.f32.mrb[0].mxu0 }
 0x105   :  { %v124_v11 = vadd.f32 %v144_v9, %v123_v10  ;;  %v161_v12 = vpop.f32.mrb[1].mxu0 }
 0x107   :  { %127 = vst [vmem:[#allocation7] sm:$0xff] %v124_v11 }
 0x108   :  { %231 = shalt.err (!%p228_p6)
}
 0x109   :  { %s232_s16 = scalar_lea.hbm %s325_s3, 128 }
 0x10a   :  { %p233_p7 = scmp.ne.s32.totalorder %s325_s3, %s232_s16  ;;  %p236_p8 = scmp.lt.u32.totalorder %s232_s16, %s325_s3 }
 0x10c   :  { %p238_p9 = pnand %p236_p8, %p233_p7 }
 0x10e   :  { %241 = shalt.err (!%p238_p9)
}
 0x10f   :  { %137 = dma.vmem_to_hbm [thread:$0]  %s135_s12, 128, %s325_s3, [#allocation4]  }
 0x110   :  { %246 = dma.done.wait [#allocation4], 128  }
 0x111   :  { %247 = vsyncadd [#allocation4], 4294967168 }
 0x112   :  { %141 = vsyncpa [#allocation3], 1 }
 0x113   :  { %142 = vsyncpa [#allocation6], 1 }
 0x114   :  { %143 = vsyncpa [#allocation4], 1 }

</bundles_post_ra>
